<compile_context>
chip_gen: v7x
topology: tpu7x:2x2x1
jax: 0.10.0
libtpu: 0.0.40
codegen_flags: <defaults>
</compile_context>

<pallas_src>
import jax
import jax.numpy as jnp
import numpy as np
from jax.experimental import pallas as pl
from jax.experimental.pallas import tpu as pltpu

NEG_INF = -1e30  # bias for padded head columns: exp() underflows to 0
C_PAD = 128      # lane-dense output width


def mlp_kernel(x_ref, w1, b1, w2, b2, wh, bh, o_ref):
    # x tile is bf16 (tb, Fin); all dots accumulate in f32 on the MXU.
    h = jnp.dot(x_ref[...], w1[...], preferred_element_type=jnp.float32)
    h = jnp.maximum(h + b1[...], 0.0)

    h = jnp.dot(h.astype(jnp.bfloat16), w2[...],
                preferred_element_type=jnp.float32)
    h = jnp.maximum(h + b2[...], 0.0)

    # Head: (tb, H2) @ (H2, 128). Padded columns carry a -1e30 bias, so they
    # contribute exp(...) == 0 to the normalizer and real columns are exact.
    logits = jnp.dot(h.astype(jnp.bfloat16), wh[...],
                     preferred_element_type=jnp.float32) + bh[...]
    m = jnp.max(logits, axis=-1, keepdims=True)
    z = logits - m
    lse = jnp.log(jnp.sum(jnp.exp(z), axis=-1, keepdims=True))
    o_ref[...] = z - lse


def prepare_kernel_params(params, c_pad=C_PAD):
    """Fold eval-mode BN (y = x*s + c) into the following Linear, pad the head
    to a lane-dense 128-wide output, and cast weights to bf16."""
    (bn0_s, bn0_b, w1, b1, bn1_s, bn1_b,
     w2, b2, bn2_s, bn2_b, wh, bh) = params

    # (x*s + c) @ W + b  ==  x @ (diag(s) W) + (c @ W + b)
    w1f = bn0_s.reshape(-1, 1) * w1
    b1f = b1 + bn0_b @ w1
    w2f = bn1_s.reshape(-1, 1) * w2
    b2f = b2 + bn1_b @ w2
    whf = bn2_s.reshape(-1, 1) * wh
    bhf = bh + bn2_b @ wh

    h2, c = whf.shape
    whp = jnp.zeros((h2, c_pad), jnp.float32).at[:, :c].set(whf)
    bhp = jnp.full((1, c_pad), NEG_INF, jnp.float32).at[:, :c].set(bhf)

    # bf16 weights feed the MXU natively and halve HBM/VMEM bytes; biases
    # stay f32 (post-MXU VPU add).
    return (w1f.astype(jnp.bfloat16), b1f,
            w2f.astype(jnp.bfloat16), b2f,
            whp.astype(jnp.bfloat16), bhp)


def mlp_forward(x, kparams, *, num_classes, tb=512):
    """x: (B, input_size) float32. Returns (B, num_classes) log-probs."""
    w1, b1, w2, b2, wh, bh = kparams
    B, Fin = x.shape
    Cp = wh.shape[1]

    # Batch tiling: tb a multiple of 8, clamped for small batches; pad the
    # batch so any B works (padded rows computed and discarded).
    tb = max(8, min(tb, ((B + 7) // 8) * 8))
    tb = ((tb + 7) // 8) * 8
    grid_m = pl.cdiv(B, tb)
    b_pad = grid_m * tb
    if b_pad != B:
        x = jnp.pad(x, ((0, b_pad - B), (0, 0)))
    x = x.astype(jnp.bfloat16)

    def full(arr):
        # Full-array block, identical for every grid step.
        return pl.BlockSpec(arr.shape, lambda i: (0,) * arr.ndim)

    out = pl.pallas_call(
        mlp_kernel,
        out_shape=jax.ShapeDtypeStruct((b_pad, Cp), jnp.float32),
        grid=(grid_m,),
        in_specs=[
            pl.BlockSpec((tb, Fin), lambda i: (i, 0)),   # x tile
            full(w1), full(b1),                          # fused BN0+Linear1
            full(w2), full(b2),                          # fused BN1+Linear2
            full(wh), full(bh),                          # fused BN2+head (padded)
        ],
        out_specs=pl.BlockSpec((tb, Cp), lambda i: (i, 0)),
        compiler_params=pltpu.CompilerParams(
            dimension_semantics=("parallel",)),
    )(x, w1, b1, w2, b2, wh, bh)

    return out[:B, :num_classes]


def make_params(key, input_size, hidden, num_classes):
    """Deterministic parameter init. BatchNorm (eval) expressed as scale/bias."""
    keys = jax.random.split(key, 16)
    eps = 1e-5

    def bn_fold(kg, kb, km, kv, dim):
        gamma = 1.0 + 0.1 * jax.random.normal(kg, (dim,), jnp.float32)
        beta = 0.1 * jax.random.normal(kb, (dim,), jnp.float32)
        running_mean = 0.1 * jax.random.normal(km, (dim,), jnp.float32)
        running_var = 1.0 + 0.1 * jax.random.uniform(kv, (dim,), jnp.float32)
        scale = gamma / jnp.sqrt(running_var + eps)
        bias = beta - running_mean * scale
        return scale.reshape(1, dim), bias.reshape(1, dim)

    def linear(kw, kb, fin, fout):
        bound = 1.0 / np.sqrt(fin)
        w = jax.random.uniform(kw, (fin, fout), jnp.float32, -bound, bound)
        b = jax.random.uniform(kb, (1, fout), jnp.float32, -bound, bound)
        return w, b

    h1, h2 = hidden
    bn0_s, bn0_b = bn_fold(keys[0], keys[1], keys[2], keys[3], input_size)
    w1, b1 = linear(keys[4], keys[5], input_size, h1)
    bn1_s, bn1_b = bn_fold(keys[6], keys[7], keys[8], keys[9], h1)
    w2, b2 = linear(keys[10], keys[11], h1, h2)
    bn2_s, bn2_b = bn_fold(keys[12], keys[13], keys[14], keys[15], h2)
    kh = jax.random.split(jax.random.fold_in(key, 99), 2)
    wh, bh = linear(kh[0], kh[1], h2, num_classes)
    return (bn0_s, bn0_b, w1, b1, bn1_s, bn1_b,
            w2, b2, bn2_s, bn2_b, wh, bh)


def mlp_reference(x, params):
    """Pure-JAX f32 reference of the same forward (unfolded BN), for checks."""
    (bn0_s, bn0_b, w1, b1, bn1_s, bn1_b,
     w2, b2, bn2_s, bn2_b, wh, bh) = params
    h = x * bn0_s + bn0_b
    h = jnp.maximum(h @ w1 + b1, 0.0) * bn1_s + bn1_b
    h = jnp.maximum(h @ w2 + b2, 0.0) * bn2_s + bn2_b
    logits = h @ wh + bh
    return jax.nn.log_softmax(logits, axis=1)


if __name__ == "__main__":
    input_size = 32
    hidden = [64, 32]
    num_classes = 4
    batch = 16

    key = jax.random.PRNGKey(0)
    kx, kp = jax.random.split(key)
    x = jax.random.normal(kx, (batch, input_size), jnp.float32)
    params = make_params(kp, input_size, hidden, num_classes)
    kparams = prepare_kernel_params(params)

    out = mlp_forward(x, kparams, num_classes=num_classes, tb=512)
    out = jax.block_until_ready(out)

    ref = jax.block_until_ready(mlp_reference(x, params))
    assert out.shape == (batch, num_classes)
    # bf16 MXU inputs -> looser tolerance than the pure-f32 reference.
    np.testing.assert_allclose(np.asarray(out), np.asarray(ref),
                               rtol=5e-2, atol=5e-2)
    print("KERNEL_OK")
</pallas_src>

<mosaic_0001>
module attributes {stable_mosaic.version = 11 : i64} {
  func.func @mlp_kernel(%arg0: i32, %arg1: memref<16x32xbf16, #tpu.memory_space<vmem>>, %arg2: memref<32x64xbf16, #tpu.memory_space<vmem>>, %arg3: memref<1x64xf32, #tpu.memory_space<vmem>>, %arg4: memref<64x32xbf16, #tpu.memory_space<vmem>>, %arg5: memref<1x32xf32, #tpu.memory_space<vmem>>, %arg6: memref<32x128xbf16, #tpu.memory_space<vmem>>, %arg7: memref<1x128xf32, #tpu.memory_space<vmem>>, %arg8: memref<16x128xf32, #tpu.memory_space<vmem>>) attributes {dimension_semantics = [#tpu.dimension_semantics<parallel>], iteration_bounds = array<i64: 1>, scalar_prefetch = 0 : i64, scratch_operands = 0 : i64, tpu.core_type = #tpu.core_type<tc>, window_params = [{transform_indices = @transform_0, window_bounds = array<i64: 16, 32>}, {pipeline_mode = #tpu.pipeline_mode<synchronous>, transform_indices = @transform_1, window_bounds = array<i64: 32, 64>}, {pipeline_mode = #tpu.pipeline_mode<synchronous>, transform_indices = @transform_2, window_bounds = array<i64: 1, 64>}, {pipeline_mode = #tpu.pipeline_mode<synchronous>, transform_indices = @transform_3, window_bounds = array<i64: 64, 32>}, {pipeline_mode = #tpu.pipeline_mode<synchronous>, transform_indices = @transform_4, window_bounds = array<i64: 1, 32>}, {pipeline_mode = #tpu.pipeline_mode<synchronous>, transform_indices = @transform_5, window_bounds = array<i64: 32, 128>}, {pipeline_mode = #tpu.pipeline_mode<synchronous>, transform_indices = @transform_6, window_bounds = array<i64: 1, 128>}, {transform_indices = @transform_7, window_bounds = array<i64: 16, 128>}]} {
    %c0 = arith.constant 0 : index
    %c0_0 = arith.constant 0 : index
    %0 = vector.load %arg1[%c0, %c0_0] : memref<16x32xbf16, #tpu.memory_space<vmem>>, vector<16x32xbf16>
    %c0_1 = arith.constant 0 : index
    %c0_2 = arith.constant 0 : index
    %1 = vector.load %arg2[%c0_1, %c0_2] : memref<32x64xbf16, #tpu.memory_space<vmem>>, vector<32x64xbf16>
    %cst = arith.constant dense<0.000000e+00> : vector<16x64xf32>
    %2 = tpu.matmul %0, %1, %cst {dimension_numbers = #tpu.dot_dimension_numbers<[1], [0], [0], [1], [0, 0, 1, 1], [], []>} : vector<16x32xbf16>, vector<32x64xbf16>, vector<16x64xf32> -> vector<16x64xf32>
    %c0_3 = arith.constant 0 : index
    %c0_4 = arith.constant 0 : index
    %3 = vector.load %arg3[%c0_3, %c0_4] : memref<1x64xf32, #tpu.memory_space<vmem>>, vector<1x64xf32>
    %4 = vector.broadcast %3 : vector<1x64xf32> to vector<16x64xf32>
    %5 = arith.addf %2, %4 : vector<16x64xf32>
    %cst_5 = arith.constant 0.000000e+00 : f32
    %6 = vector.broadcast %cst_5 : f32 to vector<16x64xf32>
    %7 = arith.maximumf %5, %6 : vector<16x64xf32>
    %8 = arith.truncf %7 : vector<16x64xf32> to vector<16x64xbf16>
    %c0_6 = arith.constant 0 : index
    %c0_7 = arith.constant 0 : index
    %9 = vector.load %arg4[%c0_6, %c0_7] : memref<64x32xbf16, #tpu.memory_space<vmem>>, vector<64x32xbf16>
    %cst_8 = arith.constant dense<0.000000e+00> : vector<16x32xf32>
    %10 = tpu.matmul %8, %9, %cst_8 {dimension_numbers = #tpu.dot_dimension_numbers<[1], [0], [0], [1], [0, 0, 1, 1], [], []>} : vector<16x64xbf16>, vector<64x32xbf16>, vector<16x32xf32> -> vector<16x32xf32>
    %c0_9 = arith.constant 0 : index
    %c0_10 = arith.constant 0 : index
    %11 = vector.load %arg5[%c0_9, %c0_10] : memref<1x32xf32, #tpu.memory_space<vmem>>, vector<1x32xf32>
    %12 = vector.broadcast %11 : vector<1x32xf32> to vector<16x32xf32>
    %13 = arith.addf %10, %12 : vector<16x32xf32>
    %cst_11 = arith.constant 0.000000e+00 : f32
    %14 = vector.broadcast %cst_11 : f32 to vector<16x32xf32>
    %15 = arith.maximumf %13, %14 : vector<16x32xf32>
    %16 = arith.truncf %15 : vector<16x32xf32> to vector<16x32xbf16>
    %c0_12 = arith.constant 0 : index
    %c0_13 = arith.constant 0 : index
    %17 = vector.load %arg6[%c0_12, %c0_13] : memref<32x128xbf16, #tpu.memory_space<vmem>>, vector<32x128xbf16>
    %cst_14 = arith.constant dense<0.000000e+00> : vector<16x128xf32>
    %18 = tpu.matmul %16, %17, %cst_14 {dimension_numbers = #tpu.dot_dimension_numbers<[1], [0], [0], [1], [0, 0, 1, 1], [], []>} : vector<16x32xbf16>, vector<32x128xbf16>, vector<16x128xf32> -> vector<16x128xf32>
    %c0_15 = arith.constant 0 : index
    %c0_16 = arith.constant 0 : index
    %19 = vector.load %arg7[%c0_15, %c0_16] : memref<1x128xf32, #tpu.memory_space<vmem>>, vector<1x128xf32>
    %20 = vector.broadcast %19 : vector<1x128xf32> to vector<16x128xf32>
    %21 = arith.addf %18, %20 : vector<16x128xf32>
    %cst_17 = arith.constant dense<0xFF800000> : vector<16xf32>
    %22 = vector.multi_reduction <maximumf>, %21, %cst_17 [1] : vector<16x128xf32> to vector<16xf32>
    %23 = vector.shape_cast %22 : vector<16xf32> to vector<16x1xf32>
    %24 = vector.broadcast %23 : vector<16x1xf32> to vector<16x128xf32>
    %25 = arith.subf %21, %24 : vector<16x128xf32>
    %26 = math.exp %25 : vector<16x128xf32>
    %cst_18 = arith.constant dense<0.000000e+00> : vector<16xf32>
    %27 = vector.multi_reduction <add>, %26, %cst_18 [1] : vector<16x128xf32> to vector<16xf32>
    %28 = vector.shape_cast %27 : vector<16xf32> to vector<16x1xf32>
    %29 = math.log %28 : vector<16x1xf32>
    %30 = vector.broadcast %29 : vector<16x1xf32> to vector<16x128xf32>
    %31 = arith.subf %25, %30 : vector<16x128xf32>
    %c0_19 = arith.constant 0 : index
    %c0_20 = arith.constant 0 : index
    %32 = vector.load %arg8[%c0_19, %c0_20] : memref<16x128xf32, #tpu.memory_space<vmem>>, vector<16x128xf32>
    tpu.vector_store %arg8[%c0_19, %c0_20], %31 {strides = array<i32>} : memref<16x128xf32, #tpu.memory_space<vmem>>, vector<16x128xf32>,
    return
  }
  func.func @transform_0(%arg0: i32) -> (i32, i32) {
    %c0_i32 = arith.constant 0 : i32
    %c0_i32_0 = arith.constant 0 : i32
    return %arg0, %c0_i32 : i32, i32
  }
  func.func @transform_1(%arg0: i32) -> (i32, i32) {
    %c0_i32 = arith.constant 0 : i32
    %c0_i32_0 = arith.constant 0 : i32
    %c0_i32_1 = arith.constant 0 : i32
    return %c0_i32, %c0_i32_0 : i32, i32
  }
  func.func @transform_2(%arg0: i32) -> (i32, i32) {
    %c0_i32 = arith.constant 0 : i32
    %c0_i32_0 = arith.constant 0 : i32
    %c0_i32_1 = arith.constant 0 : i32
    return %c0_i32, %c0_i32_0 : i32, i32
  }
  func.func @transform_3(%arg0: i32) -> (i32, i32) {
    %c0_i32 = arith.constant 0 : i32
    %c0_i32_0 = arith.constant 0 : i32
    %c0_i32_1 = arith.constant 0 : i32
    return %c0_i32, %c0_i32_0 : i32, i32
  }
  func.func @transform_4(%arg0: i32) -> (i32, i32) {
    %c0_i32 = arith.constant 0 : i32
    %c0_i32_0 = arith.constant 0 : i32
    %c0_i32_1 = arith.constant 0 : i32
    return %c0_i32, %c0_i32_0 : i32, i32
  }
  func.func @transform_5(%arg0: i32) -> (i32, i32) {
    %c0_i32 = arith.constant 0 : i32
    %c0_i32_0 = arith.constant 0 : i32
    %c0_i32_1 = arith.constant 0 : i32
    return %c0_i32, %c0_i32_0 : i32, i32
  }
  func.func @transform_6(%arg0: i32) -> (i32, i32) {
    %c0_i32 = arith.constant 0 : i32
    %c0_i32_0 = arith.constant 0 : i32
    %c0_i32_1 = arith.constant 0 : i32
    return %c0_i32, %c0_i32_0 : i32, i32
  }
  func.func @transform_7(%arg0: i32) -> (i32, i32) {
    %c0_i32 = arith.constant 0 : i32
    %c0_i32_0 = arith.constant 0 : i32
    return %arg0, %c0_i32 : i32, i32
  }
}

</mosaic_0001>

<bundles_post_ra>
// kernel: tpu_custom_call.1
= control target key start
LH: loop header
LB: loop body
LE: loop exit
PB: predicated region body
PF: predicated region fallthrough
CT: control target
= control target key end

     0   :  { %v398_v1 = vmov 0.0   ;;  %vm399_vm0 = vmmov 0   ;;  %vm58_vm1 = vcmask 261120   ;;  %s496_s0 = inlined_call_operand.vmem [shape: bf16[16,32], index: 0, kind: input, shape index: {}]   ;;  %s497_s1 = inlined_call_operand.vmem [shape: bf16[32,64], index: 1, kind: input, shape index: {}]   ;;  %s498_s2 = inlined_call_operand.vmem [shape: f32[1,64], index: 2, kind: input, shape index: {}]   ;;  %s499_s3 = inlined_call_operand.vmem [shape: bf16[64,32], index: 3, kind: input, shape index: {}]   ;;  %s500_s4 = inlined_call_operand.vmem [shape: f32[1,32], index: 4, kind: input, shape index: {}]   ;;  %s501_s5 = inlined_call_operand.vmem [shape: bf16[32,128], index: 5, kind: input, shape index: {}]   ;;  %s502_s6 = inlined_call_operand.vmem [shape: f32[1,128], index: 6, kind: input, shape index: {}]   ;;  %s503_s7 = inlined_call_operand.hbm [shape: f32[16,128], index: 7, kind: output, shape index: {}]  }
   0x1   :  { %v357_v0 = vld [vmem:[%s497_s1] sm:$0xff]   ;;  %324 = vmatprep.subr.bf16.mxu0 %v398_v1  ;;  %332 = vmatprep.subr.bf16.mxu1 %v398_v1  ;;  %v358_v2 = vld [vmem:[%s497_s1 + $0x8] sm:$0xff]  }
   0x2   :  { %325 = vmatpush3.bf16.msra.mxu0 %v357_v0  ;;  %328 = vmatprep.mubr.msk.bf16.mxu0 %vm399_vm0, %v398_v1  ;;  %v360_v3 = vld [vmem:[%s499_s3] sm:$0xff]   ;;  %v361_v5 = vld [vmem:[%s499_s3 + $0x8] sm:$0xff]  }
   0x3   :  { %326 = vmatprep.subr.bf16.mxu0 %v398_v1  ;;  %340 = vmatprep.mubr.msk.bf16.mxu1 %vm399_vm0, %v398_v1  ;;  %v359_v4 = vld [vmem:[%s496_s0] sm:$0xff]  }
   0x4   :  { %333 = vmatpush3.bf16.msra.mxu1 %v360_v3 }
   0x5   :  { %334 = vmatprep.subr.bf16.mxu1 %v398_v1 }
   0x6   :  { %327 = vmatpush3.bf16.msra.mxu0 %v358_v2 }
   0x7   :  { %344 = vmatprep.subr.bf16.mxu0 %v398_v1 }
   0x8   :  { %12 = vsyncpa [#allocation3], 0  ;;  %335 = vmatpush3.bf16.msra.mxu1 %v361_v5  ;;  %v362_v6 = vld [vmem:[%s499_s3 + $0x10] sm:$0xff]   ;;  %v363_v7 = vld [vmem:[%s499_s3 + $0x18] sm:$0xff]   ;;  %vm145_vm2 = vcmask 523264  }
   0x9   :  { %329 = vmatmul.mubr.msk.bf16.vlgmr.msra.gmra.mrb[0].mxu0 %vm58_vm1, %v359_v4  ;;  %336 = vmatprep.subr.bf16.mxu1 %v398_v1  ;;  %v298_v8 = vld [vmem:[%s498_s2] ss:$0 sm:$0xff]  ;;  %v365_v19 = vld [vmem:[%s501_s5 + $0x8] sm:$0xff]  }
   0xa   :  { %348 = vmatprep.mubr.msk.bf16.mxu0 %vm399_vm0, %v398_v1  ;;  %v364_v18 = vld [vmem:[%s501_s5] sm:$0xff]  }
   0xb   :  { %345 = vmatpush3.bf16.msra.mxu0 %v364_v18  ;;  %v303_v20 = vld [vmem:[%s500_s4] ss:$0 sm:$0xff]  ;;  %s400_s4 = smov [#allocation2]  }
   0xc   :  { %337 = vmatpush3.bf16.msra.mxu1 %v362_v6  ;;  %346 = vmatprep.subr.bf16.mxu0 %v398_v1  ;;  %v309_v30 = vld [vmem:[%s502_s6] ss:$0 sm:$0xff]  ;;  %s287_s5 = sshll.u32 %s400_s4, 4  ;;  %s288_s5 = int_to_ptr.vmem [resolvable:$true] %s287_s5 }
   0xd   :  { %338 = vmatprep.subr.bf16.mxu1 %v398_v1  ;;  %s374_s6 = scalar_lea.vmem %s288_s5, 256  ;;  %p379_p1 = scmp.lt.s32.totalorder %s288_s5, %s288_s5 }
   0xe   :  { %p375_p0 = scmp.ne.s32.totalorder %s288_s5, %s374_s6  ;;  %p380_p2 = scmp.lt.s32.totalorder %s374_s6, %s374_s6 }
   0xf   :  { %347 = vmatpush3.bf16.msra.mxu0 %v365_v19 }
  0x10   :  { %339 = vmatpush3.bf16.msra.mxu1 %v363_v7  ;;  %p381_p3 = por %p380_p2, %p379_p1 }
  0x12   :  { %p382_p4 = pnand %p381_p3, %p375_p0 }
  0xdc   :  { %v96_v9 = vpop.f32.mrb[0].mxu0 }
  0xdd   :  { %v97_v10 = vadd.f32 %v298_v8, %v96_v9  ;;  %v330_v11 = vpop.f32.mrb[1].mxu0 }
  0xde   :  { %v99_v12 = vpop.f32.mrb[2].mxu0 }
  0xdf   :  { %v100_v13 = vadd.f32 %v298_v8, %v99_v12  ;;  %v331_v14 = vpop.f32.mrb[3].mxu0  ;;  %v103_v15 = vmax.f32 %v97_v10, 0.0 }
  0xe1   :  { %v104_v16 = vmax.f32 %v100_v13, 0.0 }
  0xe3   :  { %v105_v17 = vpack.c.bf16 %v104_v16, %v103_v15 }
  0xe5   :  { %341 = vmatmul.mubr.msk.bf16.vlgmr.msra.gmra.mrb[0].mxu1 %vm145_vm2, %v105_v17 }
 0x1b8   :  { %v183_v21 = vpop.f32.mrb[0].mxu1 }
 0x1b9   :  { %v184_v22 = vadd.f32 %v303_v20, %v183_v21  ;;  %v342_v23 = vpop.f32.mrb[1].mxu1 }
 0x1ba   :  { %v186_v24 = vpop.f32.mrb[2].mxu1 }
 0x1bb   :  { %v187_v25 = vadd.f32 %v303_v20, %v186_v24  ;;  %v343_v26 = vpop.f32.mrb[3].mxu1  ;;  %v190_v27 = vmax.f32 %v184_v22, 0.0 }
 0x1bd   :  { %v191_v28 = vmax.f32 %v187_v25, 0.0 }
 0x1bf   :  { %v192_v29 = vpack.c.bf16 %v191_v28, %v190_v27 }
 0x1c1   :  { %349 = vmatmul.mubr.msk.bf16.vlgmr.msra.gmra.mrb[4].mxu0 %vm58_vm1, %v192_v29 }
 0x294   :  { %v253_v31 = vpop.f32.mrb[4].mxu0 }
 0x295   :  { %v254_v32 = vadd.f32 %v309_v30, %v253_v31  ;;  %v350_v33 = vpop.f32.mrb[5].mxu0 }
 0x296   :  { %v256_v34 = vpop.f32.mrb[6].mxu0 }
 0x297   :  { %260 = vmax.xlane.f32.xlu0 %v254_v32  ;;  %v351_v35 = vpop.f32.mrb[7].mxu0  ;;  %v257_v36 = vadd.f32 %v309_v30, %v256_v34 }
 0x29b   :  { %262 = vmax.xlane.f32.xlu0 %v257_v36 }
 0x324   :  { %v261_v37 = vpop.xlane.xlu0 %260 }
 0x325   :  { %v264_v38 = vsub.f32 %v254_v32, %v261_v37 }
 0x327   :  { %v266_v39 = vmul.f32 1.442695, %v264_v38 }
 0x328   :  { %v263_v40 = vpop.xlane.xlu0 %262 }
 0x329   :  { %v265_v41 = vsub.f32 %v257_v36, %v263_v40  ;;  %366 = vpow2.f32 %v266_v39 }
 0x32b   :  { %v268_v42 = vmul.f32 1.442695, %v265_v41 }
 0x32d   :  { %368 = vpow2.f32 %v268_v42 }
 0x333   :  { %v367_v43 = vpop.eup %366 }
 0x334   :  { %270 = vadd.xlane.f32.xlu1 %v367_v43 }
 0x337   :  { %v369_v44 = vpop.eup %368 }
 0x338   :  { %272 = vadd.xlane.f32.xlu1 %v369_v44 }
 0x3c1   :  { %v271_v45 = vpop.xlane.xlu1 %270 }
 0x3c2   :  { %370 = vlog2.f32 %v271_v45 }
 0x3c5   :  { %v273_v46 = vpop.xlane.xlu1 %272 }
 0x3c6   :  { %372 = vlog2.f32 %v273_v46 }
 0x3cc   :  { %v371_v47 = vpop.eup %370 }
 0x3cd   :  { %v275_v48 = vmul.f32 0.6931472, %v371_v47 }
 0x3cf   :  { %v278_v49 = vsub.f32 %v264_v38, %v275_v48 }
 0x3d0   :  { %v373_v50 = vpop.eup %372 }
 0x3d1   :  { %280 = vst [vmem:[#allocation2] sm:$0xff] %v278_v49  ;;  %v277_v51 = vmul.f32 0.6931472, %v373_v50 }
 0x3d3   :  { %v279_v52 = vsub.f32 %v265_v41, %v277_v51 }
 0x3d5   :  { %281 = vst [vmem:[#allocation2 + $0x8] sm:$0xff] %v279_v52 }
 0x3d6   :  { %385 = shalt.err (!%p382_p4)
}
 0x3d7   :  { %s386_s23 = scalar_lea.hbm %s503_s7, 256 }
 0x3d8   :  { %p387_p5 = scmp.ne.s32.totalorder %s503_s7, %s386_s23  ;;  %p390_p6 = scmp.lt.u32.totalorder %s386_s23, %s503_s7 }
 0x3da   :  { %p392_p7 = pnand %p390_p6, %p387_p5 }
 0x3dc   :  { %395 = shalt.err (!%p392_p7)
}
 0x3dd   :  { %s401_s28 = smov 128   ;;  %s402_s29 = smov 8  }
 0x3de   :  { %293 = dma.vmem_to_hbm [thread:$0]  %s288_s5, 256, %s503_s7, [#allocation3], %s401_s28, %s401_s28, %s402_s29  }
 0x3df   :  { %396 = dma.done.wait [#allocation3], 256  }
 0x3e0   :  { %397 = vsyncadd [#allocation3], 4294967040 }
 0x3e1   :  { %297 = vsyncpa [#allocation3], 1 }

</bundles_post_ra>
